<compile_context>
chip_gen: v6e
topology: v6e:2x2x1
jax: 0.10.0
libtpu: 0.0.40
codegen_flags: <defaults>
</compile_context>

<pallas_src>
import math

import jax
import jax.numpy as jnp
from jax.experimental import pallas as pl
from jax.experimental.pallas import tpu as pltpu

_HIGHEST = jax.lax.Precision.HIGHEST


# ----------------------------------------------------------------------------
# In-kernel helpers
# ----------------------------------------------------------------------------
def _repack_rows_into_pad(pad_ref, rows_src, H, W, Wp):
    """Zero the padded scratch and copy H W-wide rows in at a +1 col offset.

    rows_src(i) must return an f32 (C, W) row value.  Padded flat layout:
    (H+3) rows of length Wp = W+2 (1 top pad row, interior rows 1..H, 1 bottom
    pad row plus 1 slack row so every tap window is an in-bounds lane slice).
    """
    pad_ref[...] = jnp.zeros_like(pad_ref)
    for i in range(H):
        row = rows_src(i)                                         # (C, W) f32
        pad_ref[:, (i + 1) * Wp + 1:(i + 1) * Wp + 1 + W] = row.astype(pad_ref.dtype)


def _acc9(pad_ref, w_ref, b_ref, L1, Wp):
    """3x3 conv as 9 accumulated bf16 MXU dots (f32 accumulation).

    Stride-1 output at flat m = i*Wp + j reads padded flat index m + kh*Wp + kw
    for tap (kh, kw); columns j in {W, W+1} straddle row boundaries and are
    junk (callers never store them).
    """
    acc = None
    t = 0
    for kh in range(3):
        for kw in range(3):
            tap = pad_ref[:, kh * Wp + kw: kh * Wp + kw + L1]     # (Cin, L1) bf16
            d = jnp.dot(w_ref[t], tap, preferred_element_type=jnp.float32)
            acc = d if acc is None else acc + d
            t += 1
    return acc + b_ref[...]                                       # (Cout, L1) f32


# ----------------------------------------------------------------------------
# Pallas kernels
# ----------------------------------------------------------------------------
def _lateral1x1_kernel(x_ref, w_ref, b_ref, o_ref):
    # x: (1, Cin, H*W) f32; w: (Cout, Cin) bf16; b: (Cout, 1) f32.
    acc = jnp.dot(w_ref[...], x_ref[0].astype(jnp.bfloat16),
                  preferred_element_type=jnp.float32)
    o_ref[0] = (acc + b_ref[...]).astype(o_ref.dtype)


def _make_conv3x3_s1_kernel(H, W):
    Wp = W + 2
    L1 = H * Wp

    def kernel(x_ref, w_ref, b_ref, o_ref, pad_ref):
        _repack_rows_into_pad(
            pad_ref, lambda i: x_ref[0, :, i * W:(i + 1) * W], H, W, Wp)
        acc = _acc9(pad_ref, w_ref, b_ref, L1, Wp)
        for i in range(H):          # compact store: drop the 2 junk cols / row
            o_ref[0, :, i * W:(i + 1) * W] = acc[:, i * Wp:i * Wp + W].astype(o_ref.dtype)

    return kernel


def _make_conv3x3_s2_kernel(H, W):
    Wp = W + 2
    L1 = H * Wp
    Hout = (H - 1) // 2 + 1
    Wout = (W - 1) // 2 + 1

    def kernel(x_ref, w_ref, b_ref, sel_ref, o_ref, pad_ref):
        _repack_rows_into_pad(
            pad_ref, lambda i: x_ref[0, :, i * W:(i + 1) * W], H, W, Wp)
        acc = _acc9(pad_ref, w_ref, b_ref, L1, Wp)
        sel = sel_ref[...]                                        # (Wp, Wout) 0/1
        for i in range(Hout):
            # output row i <- even columns of stride-1 row 2*i (exact 0/1 matmul).
            row = acc[:, (2 * i) * Wp:(2 * i) * Wp + Wp]          # (Cout, Wp) f32
            dec = jnp.dot(row, sel, preferred_element_type=jnp.float32,
                          precision=_HIGHEST)                      # (Cout, Wout)
            o_ref[0, :, i * Wout:(i + 1) * Wout] = dec.astype(o_ref.dtype)

    return kernel


def _make_fused_td_conv_kernel(H, W):
    """Fused top-down step: merged = fine + up2(coarse); out = conv3x3(merged)."""
    Wp = W + 2
    L1 = H * Wp
    wc = W // 2  # coarse width

    def kernel(fine_ref, coarse_ref, uw_ref, w_ref, b_ref,
               out_ref, merged_ref, pad_ref):
        pad_ref[...] = jnp.zeros_like(pad_ref)
        uw = uw_ref[...]                                          # (wc, W) 0/1
        for r in range(H // 2):
            coarse_row = coarse_ref[0, :, r * wc:(r + 1) * wc]    # (C, wc) f32
            up_row = jnp.dot(coarse_row, uw,
                             preferred_element_type=jnp.float32,
                             precision=_HIGHEST)                  # exact width x2
            for di in range(2):                                   # height x2: reuse row
                i = 2 * r + di
                m_row = fine_ref[0, :, i * W:(i + 1) * W] + up_row
                merged_ref[0, :, i * W:(i + 1) * W] = m_row.astype(merged_ref.dtype)
                pad_ref[:, (i + 1) * Wp + 1:(i + 1) * Wp + 1 + W] = (
                    m_row.astype(pad_ref.dtype))
        acc = _acc9(pad_ref, w_ref, b_ref, L1, Wp)
        for i in range(H):
            out_ref[0, :, i * W:(i + 1) * W] = acc[:, i * Wp:i * Wp + W].astype(out_ref.dtype)

    return kernel


# ----------------------------------------------------------------------------
# Wrappers around pallas_call
# ----------------------------------------------------------------------------
def _prep_conv3x3_weights(w, b):
    kh, kw, Cin, Cout = w.shape
    assert (kh, kw) == (3, 3)
    w9 = jnp.transpose(w, (0, 1, 3, 2)).reshape(9, Cout, Cin).astype(jnp.bfloat16)
    b2 = b.reshape(Cout, 1).astype(jnp.float32)
    return w9, b2


def conv1x1_pallas(x, w, b):
    """1x1 conv (lateral).  x: (N, Cin, H, W) NCHW; w: (1, 1, Cin, Cout) HWIO."""
    N, Cin, H, W = x.shape
    Cout = w.shape[-1]
    xf = x.reshape(N, Cin, H * W)
    w_mat = jnp.transpose(w[0, 0], (1, 0)).astype(jnp.bfloat16)   # (Cout, Cin)
    out = pl.pallas_call(
        _lateral1x1_kernel,
        out_shape=jax.ShapeDtypeStruct((N, Cout, H * W), x.dtype),
        grid=(N,),
        in_specs=[
            pl.BlockSpec((1, Cin, H * W), lambda n: (n, 0, 0)),
            pl.BlockSpec((Cout, Cin), lambda n: (0, 0)),
            pl.BlockSpec((Cout, 1), lambda n: (0, 0)),
        ],
        out_specs=pl.BlockSpec((1, Cout, H * W), lambda n: (n, 0, 0)),
        compiler_params=pltpu.CompilerParams(dimension_semantics=("parallel",)),
    )(xf, w_mat, b.reshape(Cout, 1).astype(jnp.float32))
    return out.reshape(N, Cout, H, W)


def conv3x3_pallas(x, w, b, *, stride=1):
    """3x3 conv, pad=1, stride in {1, 2}.  x: NCHW, w: HWIO, b: (Cout,)."""
    N, Cin, H, W = x.shape
    Cout = w.shape[-1]
    Wp = W + 2
    assert stride in (1, 2)
    xf = x.reshape(N, Cin, H * W)
    w9, b2 = _prep_conv3x3_weights(w, b)
    scratch = [pltpu.VMEM((Cin, (H + 3) * Wp), jnp.bfloat16)]
    cparams = pltpu.CompilerParams(dimension_semantics=("parallel",))

    if stride == 1:
        out = pl.pallas_call(
            _make_conv3x3_s1_kernel(H, W),
            out_shape=jax.ShapeDtypeStruct((N, Cout, H * W), x.dtype),
            grid=(N,),
            in_specs=[
                pl.BlockSpec((1, Cin, H * W), lambda n: (n, 0, 0)),
                pl.BlockSpec((9, Cout, Cin), lambda n: (0, 0, 0)),
                pl.BlockSpec((Cout, 1), lambda n: (0, 0)),
            ],
            out_specs=pl.BlockSpec((1, Cout, H * W), lambda n: (n, 0, 0)),
            scratch_shapes=scratch,
            compiler_params=cparams,
        )(xf, w9, b2)
        return out.reshape(N, Cout, H, W)

    Hout = (H - 1) // 2 + 1
    Wout = (W - 1) // 2 + 1
    # precomputed per-row even-column selection (exact 0/1 data movement).
    sel = (jnp.arange(Wp)[:, None] == 2 * jnp.arange(Wout)[None, :]).astype(jnp.float32)
    out = pl.pallas_call(
        _make_conv3x3_s2_kernel(H, W),
        out_shape=jax.ShapeDtypeStruct((N, Cout, Hout * Wout), x.dtype),
        grid=(N,),
        in_specs=[
            pl.BlockSpec((1, Cin, H * W), lambda n: (n, 0, 0)),
            pl.BlockSpec((9, Cout, Cin), lambda n: (0, 0, 0)),
            pl.BlockSpec((Cout, 1), lambda n: (0, 0)),
            pl.BlockSpec((Wp, Wout), lambda n: (0, 0)),
        ],
        out_specs=pl.BlockSpec((1, Cout, Hout * Wout), lambda n: (n, 0, 0)),
        scratch_shapes=scratch,
        compiler_params=cparams,
    )(xf, w9, b2, sel)
    return out.reshape(N, Cout, Hout, Wout)


def fused_upsample_add_conv3x3_pallas(fine, coarse, w, b):
    """Returns (conv3x3(fine + up2(coarse)), fine + up2(coarse)); NCHW in/out."""
    N, C, H, W = fine.shape
    assert H % 2 == 0 and W % 2 == 0
    assert coarse.shape == (N, C, H // 2, W // 2)
    Cout = w.shape[-1]
    Wp = W + 2
    wc = W // 2
    fine_f = fine.reshape(N, C, H * W)
    coarse_f = coarse.reshape(N, C, (H // 2) * wc)
    w9, b2 = _prep_conv3x3_weights(w, b)
    # nearest x2 width-upsample as a constant 0/1 matrix (exact at HIGHEST).
    uw = (jnp.arange(wc)[:, None] == (jnp.arange(W)[None, :] // 2)).astype(jnp.float32)
    out, merged = pl.pallas_call(
        _make_fused_td_conv_kernel(H, W),
        out_shape=(jax.ShapeDtypeStruct((N, Cout, H * W), fine.dtype),
                   jax.ShapeDtypeStruct((N, C, H * W), fine.dtype)),
        grid=(N,),
        in_specs=[
            pl.BlockSpec((1, C, H * W), lambda n: (n, 0, 0)),
            pl.BlockSpec((1, C, (H // 2) * wc), lambda n: (n, 0, 0)),
            pl.BlockSpec((wc, W), lambda n: (0, 0)),
            pl.BlockSpec((9, Cout, C), lambda n: (0, 0, 0)),
            pl.BlockSpec((Cout, 1), lambda n: (0, 0)),
        ],
        out_specs=(pl.BlockSpec((1, Cout, H * W), lambda n: (n, 0, 0)),
                   pl.BlockSpec((1, C, H * W), lambda n: (n, 0, 0))),
        scratch_shapes=[pltpu.VMEM((C, (H + 3) * Wp), jnp.bfloat16)],
        compiler_params=pltpu.CompilerParams(dimension_semantics=("parallel",)),
    )(fine_f, coarse_f, uw, w9, b2)
    return out.reshape(N, Cout, H, W), merged.reshape(N, C, H, W)


# ----------------------------------------------------------------------------
# FPN forward (orchestration; all conv / upsample+add compute in Pallas)
# ----------------------------------------------------------------------------
def fpn_forward(xs_nchw, lat_params, fpn_params, *, use_levels=(1, 2, 3), num_outs=5):
    # 1. lateral 1x1 convs (no bn, no activation).
    laterals = [conv1x1_pallas(xs_nchw[lvl], *lat_params[i])
                for i, lvl in enumerate(use_levels)]
    n = len(laterals)
    outs = [None] * n

    # 2+3. top-down path: coarsest level is a plain 3x3 conv; every other level
    #      runs the fused upsample + add + 3x3 kernel and hands its merged
    #      lateral down to the next level (one HBM round trip saved per level).
    merged = laterals[n - 1]
    outs[n - 1] = conv3x3_pallas(merged, *fpn_params[n - 1], stride=1)
    for i in range(n - 2, -1, -1):
        outs[i], merged = fused_upsample_add_conv3x3_pallas(
            laterals[i], merged, *fpn_params[i])

    # 4. extra convs on the last backbone input (3x3, stride 2, pad 1), chained.
    x_in = xs_nchw[-1]
    for i in range(n, num_outs):
        x_in = conv3x3_pallas(x_in, *fpn_params[i], stride=2)
        outs.append(x_in)
    return tuple(outs)


# ----------------------------------------------------------------------------
# Pure-JAX reference (f32, HIGHEST precision; for correctness check only)
# ----------------------------------------------------------------------------
def _ref_conv(x, w, b, stride, padding):
    out = jax.lax.conv_general_dilated(
        x, w,
        window_strides=(stride, stride),
        padding=[(padding, padding), (padding, padding)],
        dimension_numbers=("NCHW", "HWIO", "NCHW"),
        precision=_HIGHEST,
    )
    return out + b[None, :, None, None]


def _ref_fpn(xs, lat_params, fpn_params, use_levels=(1, 2, 3), num_outs=5):
    laterals = [_ref_conv(xs[lvl], *lat_params[i], 1, 0)
                for i, lvl in enumerate(use_levels)]
    for i in range(len(laterals) - 1, 0, -1):
        up = jnp.repeat(jnp.repeat(laterals[i], 2, axis=2), 2, axis=3)
        laterals[i - 1] = laterals[i - 1] + up
    outs = [_ref_conv(laterals[i], *fpn_params[i], 1, 1) for i in range(len(laterals))]
    x_in = xs[-1]
    for i in range(len(laterals), num_outs):
        x_in = _ref_conv(x_in, *fpn_params[i], 2, 1)
        outs.append(x_in)
    return tuple(outs)


# ----------------------------------------------------------------------------
# Deterministic parameter init (PyTorch-style uniform bounds, HWIO layout)
# ----------------------------------------------------------------------------
def _init_conv(key, kh, kw, cin, cout):
    k1, k2 = jax.random.split(key)
    bound = 1.0 / math.sqrt(cin * kh * kw)
    w = jax.random.uniform(k1, (kh, kw, cin, cout), jnp.float32, -bound, bound)
    b = jax.random.uniform(k2, (cout,), jnp.float32, -bound, bound)
    return w, b


if __name__ == "__main__":
    key = jax.random.PRNGKey(0)

    # Small synthetic config consistent with the module structure.
    in_channels = (8, 16, 32, 64)
    out_channels = 16
    use_levels = (1, 2, 3)
    num_outs = 5
    N = 2
    spatial = (32, 16, 8, 4)

    keys = jax.random.split(key, 12)

    # Inputs: 4 NCHW feature maps (pyramid levels).
    xs = [
        jax.random.normal(keys[i], (N, in_channels[i], spatial[i], spatial[i]), jnp.float32)
        for i in range(4)
    ]

    # Lateral 1x1 convs: in_channels[lvl] -> out_channels.
    lat_params = [
        _init_conv(keys[4 + i], 1, 1, in_channels[lvl], out_channels)
        for i, lvl in enumerate(use_levels)
    ]
    # fpn convs: 3x 3x3 (C->C), then extra convs (in_channels[-1]->C, then C->C).
    fpn_params = [
        _init_conv(keys[7 + i], 3, 3, out_channels, out_channels) for i in range(3)
    ]
    fpn_params.append(_init_conv(keys[10], 3, 3, in_channels[-1], out_channels))
    fpn_params.append(_init_conv(keys[11], 3, 3, out_channels, out_channels))

    outs = fpn_forward(xs, lat_params, fpn_params, use_levels=use_levels, num_outs=num_outs)
    for o in outs:
        jax.block_until_ready(o)

    # Sanity check against a pure-JAX f32 reference.  The Pallas convs use bf16
    # MXU operands with f32 accumulation (per perf review), so parity vs the
    # f32 reference is documented at the looser tolerance below.
    refs = _ref_fpn(xs, lat_params, fpn_params, use_levels=use_levels, num_outs=num_outs)
    for got, want in zip(outs, refs):
        assert got.shape == want.shape, (got.shape, want.shape)
        err = float(jnp.max(jnp.abs(got - want)))
        assert jnp.allclose(got, want, atol=5e-2, rtol=5e-2), err

    print("KERNEL_OK")
</pallas_src>

<mosaic_0001>
module attributes {stable_mosaic.version = 11 : i64} {
  func.func @_lateral1x1_kernel(%arg0: i32, %arg1: memref<1x16x256xf32, #tpu.memory_space<vmem>>, %arg2: memref<16x16xbf16, #tpu.memory_space<vmem>>, %arg3: memref<16x1xf32, #tpu.memory_space<vmem>>, %arg4: memref<1x16x256xf32, #tpu.memory_space<vmem>>) attributes {dimension_semantics = [#tpu.dimension_semantics<parallel>], iteration_bounds = array<i64: 2>, scalar_prefetch = 0 : i64, scratch_operands = 0 : i64, tpu.core_type = #tpu.core_type<tc>, window_params = [{transform_indices = @transform_0, window_bounds = array<i64: 1, 16, 256>}, {pipeline_mode = #tpu.pipeline_mode<synchronous>, transform_indices = @transform_1, window_bounds = array<i64: 16, 16>}, {pipeline_mode = #tpu.pipeline_mode<synchronous>, transform_indices = @transform_2, window_bounds = array<i64: 16, 1>}, {transform_indices = @transform_3, window_bounds = array<i64: 1, 16, 256>}]} {
    %c0 = arith.constant 0 : index
    %c0_0 = arith.constant 0 : index
    %0 = vector.load %arg2[%c0, %c0_0] : memref<16x16xbf16, #tpu.memory_space<vmem>>, vector<16x16xbf16>
    %c0_1 = arith.constant 0 : index
    %c0_2 = arith.constant 0 : index
    %c0_3 = arith.constant 0 : index
    %1 = vector.load %arg1[%c0_1, %c0_2, %c0_3] : memref<1x16x256xf32, #tpu.memory_space<vmem>>, vector<1x16x256xf32>
    %2 = vector.shape_cast %1 : vector<1x16x256xf32> to vector<16x256xf32>
    %3 = arith.truncf %2 : vector<16x256xf32> to vector<16x256xbf16>
    %cst = arith.constant dense<0.000000e+00> : vector<16x256xf32>
    %4 = tpu.matmul %0, %3, %cst {dimension_numbers = #tpu.dot_dimension_numbers<[1], [0], [0], [1], [0, 0, 1, 1], [], []>} : vector<16x16xbf16>, vector<16x256xbf16>, vector<16x256xf32> -> vector<16x256xf32>
    %c0_4 = arith.constant 0 : index
    %c0_5 = arith.constant 0 : index
    %5 = vector.load %arg3[%c0_4, %c0_5] : memref<16x1xf32, #tpu.memory_space<vmem>>, vector<16x1xf32>
    %6 = vector.broadcast %5 : vector<16x1xf32> to vector<16x256xf32>
    %7 = arith.addf %4, %6 : vector<16x256xf32>
    %c0_6 = arith.constant 0 : index
    %c0_7 = arith.constant 0 : index
    %c0_8 = arith.constant 0 : index
    %8 = vector.load %arg4[%c0_6, %c0_7, %c0_8] : memref<1x16x256xf32, #tpu.memory_space<vmem>>, vector<1x16x256xf32>
    %9 = vector.shape_cast %8 : vector<1x16x256xf32> to vector<16x256xf32>
    %10 = vector.shape_cast %7 : vector<16x256xf32> to vector<1x16x256xf32>
    tpu.vector_store %arg4[%c0_6, %c0_7, %c0_8], %10 {strides = array<i32>} : memref<1x16x256xf32, #tpu.memory_space<vmem>>, vector<1x16x256xf32>,
    return
  }
  func.func @transform_0(%arg0: i32) -> (i32, i32, i32) {
    %c0_i32 = arith.constant 0 : i32
    %c0_i32_0 = arith.constant 0 : i32
    %c0_i32_1 = arith.constant 0 : i32
    return %arg0, %c0_i32, %c0_i32_0 : i32, i32, i32
  }
  func.func @transform_1(%arg0: i32) -> (i32, i32) {
    %c0_i32 = arith.constant 0 : i32
    %c0_i32_0 = arith.constant 0 : i32
    %c0_i32_1 = arith.constant 0 : i32
    return %c0_i32, %c0_i32_0 : i32, i32
  }
  func.func @transform_2(%arg0: i32) -> (i32, i32) {
    %c0_i32 = arith.constant 0 : i32
    %c0_i32_0 = arith.constant 0 : i32
    %c0_i32_1 = arith.constant 0 : i32
    return %c0_i32, %c0_i32_0 : i32, i32
  }
  func.func @transform_3(%arg0: i32) -> (i32, i32, i32) {
    %c0_i32 = arith.constant 0 : i32
    %c0_i32_0 = arith.constant 0 : i32
    %c0_i32_1 = arith.constant 0 : i32
    return %arg0, %c0_i32, %c0_i32_0 : i32, i32, i32
  }
}

</mosaic_0001>

<bundles_post_ra>
// kernel: tpu_custom_call.1
= control target key start
LH: loop header
LB: loop body
LE: loop exit
PB: predicated region body
PF: predicated region fallthrough
CT: control target
= control target key end

     0   :  { %8 = vsyncpa [#allocation3], 0  ;;  %s708_s0 = inlined_call_operand.hbm [shape: f32[2,16,256], index: 0, kind: input, shape index: {}]   ;;  %s709_s1 = inlined_call_operand.vmem [shape: bf16[16,16], index: 1, kind: input, shape index: {}]   ;;  %s710_s2 = inlined_call_operand.vmem [shape: f32[16,1], index: 2, kind: input, shape index: {}]   ;;  %s711_s3 = inlined_call_operand.hbm [shape: f32[2,16,256], index: 3, kind: output, shape index: {}]  }
   0x1   :  { %10 = vsyncpa [#allocation3 + $0x1], 0 }
   0x2   :  { %11 = vsyncpa [#allocation4], 0 }
   0x3   :  { %13 = vsyncpa [#allocation4 + $0x1], 0  ;;  %s545_s12 = smov 0   ;;  %s547_s13 = smov 0  }
   0x4   :  { %s549_s14 = smov 0   ;;  %s551_s15 = smov 0  }
   0x5 LB: > { %s566_s16 = sadd.s32 4294967295, %s516_s15   ;;  %s353_s17 = sadd.s32 4294967294, %s516_s15   ;;  %s516_s15 = sphi %s551_s15, %s726_s15   ;;  %s512_s14 = sphi %s549_s14, %s725_s14   ;;  %s508_s13 = sphi %s547_s13, %s724_s13   ;;  %s504_s12 = sphi %s545_s12, %s723_s12  }
   0x6   : > { %s570_s18 = sadd.s32 1, %s516_s15   ;;  %s26_s19 = sadd.s32 1, %s512_s14 }
   0x7   : > { %s23_s20 = ssub.s32 %s516_s15, %s570_s18  ;;  %p33_p0 = scmp.ne.s32.totalorder %s512_s14, %s508_s13 }
   0x8   : > { %p24_p1 = scmp.eq.s32.totalorder %s23_s20, 0  ;;  %p34_p2 = scmp.eq.s32.totalorder %s516_s15, 0 }
   0x9   : > { %p39_p3 = scmp.ne.s32.totalorder %s508_s13, %s504_s12  ;;  %p40_p4 = scmp.eq.s32.totalorder %s566_s16, 0 }
   0xa   : > { %s582_s21 = scalar_select %p24_p1, %s512_s14, %s26_s19  }
   0xb   : > { %p584_p5 = por %p34_p2, %p33_p0  ;;  %p588_p6 = por %p40_p4, %p39_p3 }
   0xc   : > { %p105_p7 = scmp.eq.s32.totalorder %s566_s16, 1  ;;  %p111_p8 = scmp.eq.s32.totalorder %s353_s17, 1 }
   0xd   : > { %s715_s23 = scalar_select %p588_p6, 1, 0 }
   0xe   : > { %p383_p10 = scmp.lt.s32.totalorder %s516_s15, 2  ;;  %p595_p11 = por %p105_p7, %p33_p0 }
   0xf   : > { %p599_p12 = por %p111_p8, %p39_p3  ;;  %s137_s26 = sand.u32 1, %s512_s14  }
  0x10   : > { %s716_s24 = scalar_select %p595_p11, 1, 0 }
  0x11   : > { %s717_s25 = scalar_select %p599_p12, 1, 0 }
  0x12   : > { %s369_s27 = sshll.u32 %s516_s15, 9  ;;  %s356_s28 = sshll.u32 %s137_s26, 5 }
  0x13   : > { %s608_s4 = scalar_lea.hbm %s708_s0, %s369_s27  ;;  %s141_s5 = scalar_lea.vmem [#allocation2], %s356_s28 }
  0x14   : > { %s148_s6 = sshll.u32 %s141_s5, 4  ;;  %p612_p13 = pnand %p383_p10, %p584_p5  ;;  %s616_s6 = int_to_ptr.vmem [resolvable:$true] %s148_s6 }
  0x15   : > { %s618_s8 = scalar_lea.sflag [#allocation3], %s137_s26  ;;  %s424_s9 = scalar_lea.hbm %s608_s4, 512 }
  0x16   : > { %p425_p0 = scmp.ne.s32.totalorder %s608_s4, %s424_s9  ;;  %p426_p1 = pneg %p612_p13 }
  0x17   : > { %s429_s17 = scalar_lea.hbm %s708_s0, 1024  ;;  %p430_p4 = scmp.lt.s32.totalorder %s608_s4, %s708_s0 }
  0x18   : > { %p427_p2 = pnand %p426_p1, %p425_p0  ;;  %p431_p5 = scmp.lt.s32.totalorder %s429_s17, %s424_s9 }
  0x1a   : > { %p428_p3 = pneg %p427_p2  ;;  %p432_p7 = por %p431_p5, %p430_p4 }
  0x1c   : > { %p433_p8 = pnand %p432_p7, %p428_p3 }
  0x1e   : > { %436 = shalt.err (!%p433_p8)
}
  0x1f   : > { %s437_s22 = scalar_lea.vmem %s616_s6, 512  ;;  %s518_s26 = smov [#allocation2]  }
  0x20   : > { %p438_p10 = scmp.ne.s32.totalorder %s616_s6, %s437_s22  ;;  %s442_s27 = sshll.u32 %s518_s26, 4  ;;  %s443_s27 = int_to_ptr.vmem [resolvable:$false] %s442_s27 }
  0x21   : > { %s444_s28 = scalar_lea.vmem %s443_s27, 1024  ;;  %p445_p2 = scmp.lt.s32.totalorder %s616_s6, %s443_s27 }
  0x22   : > { %p440_p9 = pnand %p438_p10, %p426_p1  ;;  %p446_p12 = scmp.lt.s32.totalorder %s444_s28, %s437_s22 }
  0x24   : > { %p441_p0 = pneg %p440_p9  ;;  %p447_p11 = por %p446_p12, %p445_p2 }
  0x26   : > { %p448_p6 = pnand %p447_p11, %p441_p0 }
  0x28   : > { %451 = shalt.err (!%p448_p6)
}
  0x29   : > { %s519_s29 = smov 256   ;;  %s520_s30 = smov 16  }
  0x2a   : > { %378 = dma.hbm_to_vmem [thread:$0]  (!%p612_p13), %s608_s4, 512, %s616_s6, %s618_s8, %s519_s29, %s519_s29, %s520_s30  }
  0x2b   : > { %p359_p9 = scmp.ge.s32.totalorder %s516_s15, 1  ;;  %p156_p1 = scmp.lt.s32.totalorder %s516_s15, 3 }
  0x2d   : > { %p157_p3 = pnand %p359_p9, %p156_p1 }
  0x2e   : > { %s642_s5 = sand.u32 (!%p157_p3), 1, %s508_s13   ;;  %p719_p6 = scmp.ne.s32.totalorder (!%p157_p3), %s715_s23, 0 }
  0x2f   : > { %160 = sbr.rel (%p157_p3) target bundleno = 275 (0x113), region = 32  ;;  %s360_s9 = sshll.u32 (!%p157_p3), %s642_s5, 5 }
  0x30   : > { %s163_s10 = scalar_lea.sflag (!%p157_p3), [#allocation3], %s642_s5  ;;  %s166_s11 = scalar_lea.vmem (!%p157_p3), [#allocation2], %s360_s9 }
  0x34   : > { %495 = dma.done.wait (%p719_p6), %s163_s10, 512  }
  0x35   : > { %497 = vsyncadd (%p719_p6), %s163_s10, 4294966784  ;;  %v521_v0 = vmov 0   ;;  %v193_v1 = vld [vmem:[%s166_s11 + $0x8] sm:$0xff]  ;;  %v195_v2 = vld [vmem:[%s166_s11 + $0x18] sm:$0xff]  ;;  %vm215_vm0 = vcmask 130048   ;;  %s188_s19 = scalar_lea.vmem [#allocation5], %s360_s9 }
  0x36   : > { %251 = vmatprep.mubr.bf16.mxu0 %v521_v0  ;;  %422 = vset.pattern.permute.xlu0 %v521_v0  ;;  %v192_v3 = vld [vmem:[%s166_s11] sm:$0xff]  ;;  %v197_v4 = vpack.c.bf16 %v195_v2, %v193_v1  ;;  %v194_v5 = vld [vmem:[%s166_s11 + $0x10] sm:$0xff]  ;;  %v199_v9 = vld [vmem:[%s710_s2 + $0x8] sm:$0xff]  ;;  %s280_s20 = sshll.u32 %s188_s19, 4  ;;  %s370_s22 = sshll.u32 %s566_s16, 9  ;;  %s660_s20 = int_to_ptr.vmem [resolvable:$true] %s280_s20 }
  0x37   : > { %v196_v6 = vpack.c.bf16 %v194_v5, %v192_v3  ;;  %v198_v7 = vld [vmem:[%s710_s2] sm:$0xff]  ;;  %s665_s28 = scalar_lea.hbm %s711_s3, %s370_s22  ;;  %s267_s29 = scalar_lea.sflag [#allocation4], %s642_s5 }
  0x38   : > { %233 = vmatprep.subr.bf16.mxu0 %v197_v4  ;;  %v423_v8 = vld [vmem:[%s709_s1] sm:$0xff]   ;;  %202 = vperm.xlu0 %422, %v198_v7   ;;  %s452_s16 = scalar_lea.vmem %s660_s20, 512  ;;  %p720_p12 = scmp.ne.s32.totalorder %s716_s24, 0 }
  0x39   : > { %234 = vmatpush1.bf16.msra.mxu0 %v196_v6  ;;  %p453_p11 = scmp.ne.s32.totalorder %s660_s20, %s452_s16  ;;  %s522_s30 = smov [#allocation5]  }
  0x3a   : > { %s456_s9 = sshll.u32 %s522_s30, 4  ;;  %s457_s9 = int_to_ptr.vmem [resolvable:$false] %s456_s9 }
  0x3b   : > { %p454_p13 = pnand %p453_p11, %p720_p12  ;;  %s458_s10 = scalar_lea.vmem %s457_s9, 1024 }
  0x3c   : > { %363 = vmatmul.mubr.msk.bf16.vlgmr.msra.gmra.mxu0 %vm215_vm0, %v423_v8  ;;  %207 = vperm.xlu0 %422, %v199_v9   ;;  %p459_p5 = scmp.lt.s32.totalorder %s660_s20, %s457_s9  ;;  %p460_p7 = scmp.lt.s32.totalorder %s458_s10, %s452_s16 }
  0x3d   : > { %p455_p4 = pneg %p454_p13 }
  0x3e   : > { %p461_p8 = por %p460_p7, %p459_p5 }
  0x40   : > { %p462_p10 = pnand %p461_p8, %p455_p4 }
  0xb3   : > { %v203_v10 = vpop.permute.xlu0 %202 }
  0xb7   : > { %v208_v15 = vpop.permute.xlu0 %207 }
  0xfc   : > { %v253_v11 = vpop.f32.mrf.mxu0 }
  0xfd   : > { %v254_v12 = vadd.f32 %v253_v11, %v203_v10 }
  0xfe   : > { %v255_v13 = vpop.f32.mrf.mxu0 }
  0xff   : > { %262 = vst [vmem:[%s188_s19] sm:$0xff] %v254_v12  ;;  %v256_v14 = vadd.f32 %v255_v13, %v203_v10 }
 0x100   : > { %v257_v16 = vpop.f32.mrf.mxu0 }
 0x101   : > { %263 = vst [vmem:[%s188_s19 + $0x8] sm:$0xff] %v256_v14  ;;  %v258_v17 = vadd.f32 %v257_v16, %v208_v15 }
 0x102   : > { %v259_v18 = vpop.f32.mrf.mxu0 }
 0x103   : > { %264 = vst [vmem:[%s188_s19 + $0x10] sm:$0xff] %v258_v17  ;;  %v260_v19 = vadd.f32 %v259_v18, %v208_v15 }
 0x105   : > { %265 = vst [vmem:[%s188_s19 + $0x18] sm:$0xff] %v260_v19 }
 0x106   : > { %465 = shalt.err (!%p462_p10)
}
 0x107   : > { %s466_s11 = scalar_lea.hbm %s665_s28, 512  ;;  %s470_s7 = scalar_lea.hbm %s711_s3, 1024 }
 0x108   : > { %p467_p0 = scmp.ne.s32.totalorder %s665_s28, %s466_s11  ;;  %p471_p1 = scmp.lt.s32.totalorder %s665_s28, %s711_s3 }
 0x109   : > { %p472_p3 = scmp.lt.s32.totalorder %s470_s7, %s466_s11 }
 0x10a   : > { %p468_p2 = pnand %p467_p0, %p720_p12 }
 0x10b   : > { %p473_p6 = por %p472_p3, %p471_p1 }
 0x10c   : > { %p469_p9 = pneg %p468_p2 }
 0x10e   : > { %p474_p11 = pnand %p473_p6, %p469_p9 }
 0x110   : > { %477 = shalt.err (!%p474_p11)
}
 0x111   : > { %s523_s17 = smov 256   ;;  %s524_s19 = smov 16  }
 0x112   : > { %373 = dma.vmem_to_hbm [thread:$0]  (%p720_p12), %s660_s20, 512, %s665_s28, %s267_s29, %s523_s17, %s523_s17, %s524_s19  }
 0x113 PF: > { %s295_s22 = sand.u32 1, %s504_s12   ;;  %p721_p13 = scmp.ne.s32.totalorder %s717_s25, 0 }
 0x114   : > { %p722_p4 = scmp.ge.s32.totalorder %s516_s15, 2  ;;  %s296_s26 = scalar_lea.sflag [#allocation4], %s295_s22 }
 0x116   : > { %p380_p5 = pnand %p722_p4, %p721_p13 }
 0x118   : > { %p381_p7 = pneg %p380_p5 }
 0x11a   : > { %499 = dma.done.wait (%p381_p7), %s296_s26, 512  }
 0x11b   : > { %501 = vsyncadd (%p381_p7), %s296_s26, 4294966784  ;;  %p16_p8 = scmp.ge.s32.totalorder %s570_s18, 4   ;;  %s723_s12 = smov %s508_s13 }
 0x11c   : > { %s724_s13 = smov %s512_s14  ;;  %s725_s14 = smov %s582_s21 }
 0x11d   : > { %s726_s15 = smov %s570_s18  ;;  %18 = sbr.rel (!%p16_p8) target bundleno = 5 (0x5), region = 77 }
 0x122   :  { %301 = vsyncpa [#allocation3], 1 }
 0x123   :  { %303 = vsyncpa [#allocation3 + $0x1], 1 }
 0x124   :  { %304 = vsyncpa [#allocation4], 1 }
 0x125   :  { %306 = vsyncpa [#allocation4 + $0x1], 1 }

</bundles_post_ra>
